<compile_context>
chip_gen: v7x
topology: tpu7x:2x2x1
jax: 0.10.0
libtpu: 0.0.40
codegen_flags: <defaults>
</compile_context>

<pallas_src>
import jax
import jax.numpy as jnp
from jax.experimental import pallas as pl
from jax.experimental.pallas import tpu as pltpu


# ---------------------------------------------------------------------------
# Fused Pallas kernel: embedding (one-hot matmul) + GRU recurrence + masking
# ---------------------------------------------------------------------------
def _encoder_gru_kernel(table_ref, whh_ref, bhhn_ref, words_ref, len_ref,
                        out_ref, h_ref):
    """table_ref : (V, 3D) f32  per-token input gates: emb @ W_ih_f + b_gi, [r|z|n]
       whh_ref   : (D, 3D) f32  fused recurrent weights, [r|z|n]
       bhhn_ref  : (1, D)  f32  recurrent bias of the n gate (inside r*(...))
       words_ref : (B, T)  i32  token ids
       len_ref   : (B, 1)  i32  sequence lengths
       out_ref   : (B, T*D) f32 per-step outputs, batch-major, lane-dense
       h_ref     : (B, D)  f32  final hidden state
    """
    B, T = words_ref.shape
    V = table_ref.shape[0]
    D = whh_ref.shape[0]

    table = table_ref[...]                                    # (V, 3D)
    whh = whh_ref[...]                                        # (D, 3D)
    words = words_ref[...]                                    # (B, T) int32

    # Hoisted broadcasts (loop-invariant; JAX does not CSE broadcast_in_dim).
    bhh_n = jnp.broadcast_to(bhhn_ref[...], (B, D))           # (B, D)
    lens = jnp.broadcast_to(len_ref[...], (B, D))             # (B, D) int32
    v_iota = jax.lax.broadcasted_iota(jnp.int32, (B, V), 1)   # (B, V)

    h = jnp.zeros((B, D), jnp.float32)
    outs = []
    for t in range(T):                                        # static unroll (T small)
        # --- independent of h (hidden under recurrent-matmul latency) ------
        onehot = (v_iota == words[:, t:t + 1]).astype(jnp.float32)      # (B, V)
        gi = jnp.dot(onehot, table, preferred_element_type=jnp.float32)  # (B, 3D)
        m = lens > t                                                     # (B, D) bool

        # --- the only true serial dependence --------------------------------
        gh = jnp.dot(h, whh, preferred_element_type=jnp.float32)         # (B, 3D)
        rz = jax.nn.sigmoid(gi[:, :2 * D] + gh[:, :2 * D])   # one EUP slab for r|z
        r = rz[:, :D]
        z = rz[:, D:]
        n = jnp.tanh(gi[:, 2 * D:] + r * (gh[:, 2 * D:] + bhh_n))
        h_new = n + z * (h - n)                               # == (1-z)*n + z*h

        # packed-sequence semantics: freeze h past length, zero outputs past it
        h = jnp.where(m, h_new, h)
        outs.append(jnp.where(m, h_new, 0.0))

    # One lane-dense store: (B, T*D) = full-128-multiple lanes, single vst.
    out_ref[...] = jnp.concatenate(outs, axis=1)
    h_ref[...] = h


# ---------------------------------------------------------------------------
# One-time parameter preparation (gate fusion, bias folding, embedding table)
# ---------------------------------------------------------------------------
def prepare_params(params):
    emb, w_ih, w_hh, b_ih, b_hh = params                      # per-gate [r, z, n]
    w_ih_f = jnp.concatenate([w_ih[0], w_ih[1], w_ih[2]], axis=1)   # (D, 3D)
    w_hh_f = jnp.concatenate([w_hh[0], w_hh[1], w_hh[2]], axis=1)   # (D, 3D)
    b_gi = jnp.concatenate([b_ih[0] + b_hh[0],                      # r: b_ir + b_hr
                            b_ih[1] + b_hh[1],                      # z: b_iz + b_hz
                            b_ih[2]], axis=1)                       # n: b_in only
    # token -> input-gate table; fuses embedding lookup + input projection + bias
    table = emb.astype(jnp.float32) @ w_ih_f + b_gi                 # (V, 3D)
    pad = (-table.shape[0]) % 8                                     # sublane-align V
    if pad:
        table = jnp.pad(table, ((0, pad), (0, 0)))
    return table, w_hh_f, b_hh[2]                                   # b_hh_n: (1, D)


# ---------------------------------------------------------------------------
# Per-call forward: one pallas_call + a free reshape
# ---------------------------------------------------------------------------
def encoder_forward(words, lengths, prepped):
    table, w_hh_f, b_hh_n = prepped
    B, T = words.shape
    D = w_hh_f.shape[0]
    vmem = pl.BlockSpec(memory_space=pltpu.MemorySpace.VMEM)
    # NOTE: no grid -> runs on one TensorCore. At this size (B=4) that is
    # optimal; if B ever grows past a few sublanes, add a grid over B with
    # dimension_semantics=("parallel",) so v7x's second TC is used, and tile
    # the inputs over T with a BlockSpec if they no longer fit VMEM.
    out_flat, h = pl.pallas_call(
        _encoder_gru_kernel,
        out_shape=(
            jax.ShapeDtypeStruct((B, T * D), jnp.float32),    # lane-dense outputs
            jax.ShapeDtypeStruct((B, D), jnp.float32),        # final hidden
        ),
        in_specs=[vmem, vmem, vmem, vmem, vmem],
        out_specs=(vmem, vmem),
    )(table, w_hh_f, b_hh_n,
      words.astype(jnp.int32),
      lengths.astype(jnp.int32).reshape(B, 1))
    return out_flat.reshape(B, T, D), h          # like (out, h) of the torch module


def encoder_apply(words, lengths, params):
    return encoder_forward(words, lengths, prepare_params(params))


# ---------------------------------------------------------------------------
# Pure-JAX reference (lax.scan, un-fused per-gate math) for correctness check
# ---------------------------------------------------------------------------
def encoder_ref(words, lengths, params):
    emb, w_ih, w_hh, b_ih, b_hh = params
    x = jnp.take(emb, words, axis=0).astype(jnp.float32)
    B, T, D = x.shape
    mask = (jnp.arange(T)[None, :] < lengths[:, None]).astype(jnp.float32)

    def step(h, inp):
        xt, mt = inp
        gi = [xt @ w_ih[k] + b_ih[k, 0] for k in range(3)]
        gh = [h @ w_hh[k] + b_hh[k, 0] for k in range(3)]
        r = jax.nn.sigmoid(gi[0] + gh[0])
        z = jax.nn.sigmoid(gi[1] + gh[1])
        n = jnp.tanh(gi[2] + r * gh[2])
        h_new = (1.0 - z) * n + z * h
        mcol = mt[:, None]
        h_upd = mcol * h_new + (1.0 - mcol) * h
        return h_upd, mcol * h_new

    h_final, outs = jax.lax.scan(
        step, jnp.zeros((B, D), jnp.float32),
        (jnp.transpose(x, (1, 0, 2)), mask.T))
    return jnp.transpose(outs, (1, 0, 2)), h_final


if __name__ == "__main__":
    DICT_SIZE, DIM, B, T = 28, 32, 4, 8

    key = jax.random.PRNGKey(0)
    k_emb, k_wih, k_whh, k_bih, k_bhh, k_words = jax.random.split(key, 6)

    bound = 1.0 / jnp.sqrt(DIM)
    emb = jax.random.normal(k_emb, (DICT_SIZE, DIM), jnp.float32)
    emb = emb.at[0].set(0.0)                                   # padding_idx=0
    w_ih = jax.random.uniform(k_wih, (3, DIM, DIM), jnp.float32, -bound, bound)
    w_hh = jax.random.uniform(k_whh, (3, DIM, DIM), jnp.float32, -bound, bound)
    b_ih = jax.random.uniform(k_bih, (3, 1, DIM), jnp.float32, -bound, bound)
    b_hh = jax.random.uniform(k_bhh, (3, 1, DIM), jnp.float32, -bound, bound)
    params = (emb, w_ih, w_hh, b_ih, b_hh)

    lengths = jnp.array([8, 5, 3, 6], dtype=jnp.int32)         # max == T
    words = jax.random.randint(k_words, (B, T), 1, DICT_SIZE, jnp.int32)
    # zero out padding positions past each sequence length (padding token = 0)
    pad_mask = jnp.arange(T)[None, :] < lengths[:, None]
    words = jnp.where(pad_mask, words, 0)

    prepped = prepare_params(params)                 # one-time parameter prep
    fwd = jax.jit(encoder_forward)
    out, h = fwd(words, lengths, prepped)
    jax.block_until_ready((out, h))

    out_r, h_r = encoder_ref(words, lengths, params)
    assert out.shape == (B, T, DIM) and h.shape == (B, DIM)
    assert jnp.allclose(out, out_r, atol=1e-4, rtol=1e-4)
    assert jnp.allclose(h, h_r, atol=1e-4, rtol=1e-4)

    print("KERNEL_OK")
</pallas_src>

<mosaic_0001>
module attributes {stable_mosaic.version = 11 : i64} {
  func.func @_encoder_gru_kernel(%arg0: memref<32x96xf32, #tpu.memory_space<vmem>>, %arg1: memref<32x96xf32, #tpu.memory_space<vmem>>, %arg2: memref<1x32xf32, #tpu.memory_space<vmem>>, %arg3: memref<4x8xi32, #tpu.memory_space<vmem>>, %arg4: memref<4x1xi32, #tpu.memory_space<vmem>>, %arg5: memref<4x256xf32, #tpu.memory_space<vmem>>, %arg6: memref<4x32xf32, #tpu.memory_space<vmem>>) attributes {dimension_semantics = [], scalar_prefetch = 0 : i64, scratch_operands = 0 : i64, tpu.core_type = #tpu.core_type<tc>} {
    %c0 = arith.constant 0 : index
    %c0_0 = arith.constant 0 : index
    %0 = vector.load %arg0[%c0, %c0_0] : memref<32x96xf32, #tpu.memory_space<vmem>>, vector<32x96xf32>
    %c0_1 = arith.constant 0 : index
    %c0_2 = arith.constant 0 : index
    %1 = vector.load %arg1[%c0_1, %c0_2] : memref<32x96xf32, #tpu.memory_space<vmem>>, vector<32x96xf32>
    %c0_3 = arith.constant 0 : index
    %c0_4 = arith.constant 0 : index
    %2 = vector.load %arg3[%c0_3, %c0_4] : memref<4x8xi32, #tpu.memory_space<vmem>>, vector<4x8xi32>
    %c0_5 = arith.constant 0 : index
    %c0_6 = arith.constant 0 : index
    %3 = vector.load %arg2[%c0_5, %c0_6] : memref<1x32xf32, #tpu.memory_space<vmem>>, vector<1x32xf32>
    %4 = vector.shape_cast %3 : vector<1x32xf32> to vector<1x32xf32>
    %5 = vector.broadcast %4 : vector<1x32xf32> to vector<4x32xf32>
    %c0_7 = arith.constant 0 : index
    %c0_8 = arith.constant 0 : index
    %6 = vector.load %arg4[%c0_7, %c0_8] : memref<4x1xi32, #tpu.memory_space<vmem>>, vector<4x1xi32>
    %7 = vector.shape_cast %6 : vector<4x1xi32> to vector<4x1xi32>
    %8 = vector.broadcast %7 : vector<4x1xi32> to vector<4x32xi32>
    %9 = tpu.iota {dimensions = array<i32: 1>} : vector<4x32xi32>
    %cst = arith.constant 0.000000e+00 : f32
    %10 = vector.broadcast %cst : f32 to vector<4x32xf32>
    %11 = vector.extract_strided_slice %2 {offsets = [0, 0], sizes = [4, 1], strides = [1, 1]} : vector<4x8xi32> to vector<4x1xi32>
    %12 = vector.broadcast %11 : vector<4x1xi32> to vector<4x32xi32>
    %13 = arith.cmpi eq, %9, %12 : vector<4x32xi32>
    %14 = arith.extui %13 : vector<4x32xi1> to vector<4x32xi32>
    %15 = arith.sitofp %14 : vector<4x32xi32> to vector<4x32xf32>
    %cst_9 = arith.constant dense<0.000000e+00> : vector<4x96xf32>
    %16 = tpu.matmul %15, %0, %cst_9 {dimension_numbers = #tpu.dot_dimension_numbers<[1], [0], [0], [1], [0, 0, 1, 1], [], []>} : vector<4x32xf32>, vector<32x96xf32>, vector<4x96xf32> -> vector<4x96xf32>
    %c0_i32 = arith.constant 0 : i32
    %17 = vector.broadcast %c0_i32 : i32 to vector<4x32xi32>
    %18 = arith.cmpi sgt, %8, %17 : vector<4x32xi32>
    %cst_10 = arith.constant dense<0.000000e+00> : vector<4x96xf32>
    %19 = tpu.matmul %10, %1, %cst_10 {dimension_numbers = #tpu.dot_dimension_numbers<[1], [0], [0], [1], [0, 0, 1, 1], [], []>} : vector<4x32xf32>, vector<32x96xf32>, vector<4x96xf32> -> vector<4x96xf32>
    %20 = vector.extract_strided_slice %16 {offsets = [0, 0], sizes = [4, 64], strides = [1, 1]} : vector<4x96xf32> to vector<4x64xf32>
    %21 = vector.extract_strided_slice %19 {offsets = [0, 0], sizes = [4, 64], strides = [1, 1]} : vector<4x96xf32> to vector<4x64xf32>
    %22 = arith.addf %20, %21 : vector<4x64xf32>
    %23 = arith.negf %22 : vector<4x64xf32>
    %24 = math.exp %23 : vector<4x64xf32>
    %cst_11 = arith.constant 1.000000e+00 : f32
    %25 = vector.broadcast %cst_11 : f32 to vector<4x64xf32>
    %26 = arith.addf %25, %24 : vector<4x64xf32>
    %27 = arith.divf %25, %26 : vector<4x64xf32>
    %28 = vector.extract_strided_slice %27 {offsets = [0, 0], sizes = [4, 32], strides = [1, 1]} : vector<4x64xf32> to vector<4x32xf32>
    %29 = vector.extract_strided_slice %27 {offsets = [0, 32], sizes = [4, 32], strides = [1, 1]} : vector<4x64xf32> to vector<4x32xf32>
    %30 = vector.extract_strided_slice %16 {offsets = [0, 64], sizes = [4, 32], strides = [1, 1]} : vector<4x96xf32> to vector<4x32xf32>
    %31 = vector.extract_strided_slice %19 {offsets = [0, 64], sizes = [4, 32], strides = [1, 1]} : vector<4x96xf32> to vector<4x32xf32>
    %32 = arith.addf %31, %5 : vector<4x32xf32>
    %33 = arith.mulf %28, %32 : vector<4x32xf32>
    %34 = arith.addf %30, %33 : vector<4x32xf32>
    %35 = math.tanh %34 : vector<4x32xf32>
    %36 = arith.subf %10, %35 : vector<4x32xf32>
    %37 = arith.mulf %29, %36 : vector<4x32xf32>
    %38 = arith.addf %35, %37 : vector<4x32xf32>
    %39 = arith.select %18, %38, %10 : vector<4x32xi1>, vector<4x32xf32>
    %cst_12 = arith.constant 0.000000e+00 : f32
    %40 = vector.broadcast %cst_12 : f32 to vector<4x32xf32>
    %41 = arith.select %18, %38, %40 : vector<4x32xi1>, vector<4x32xf32>
    %42 = vector.extract_strided_slice %2 {offsets = [0, 1], sizes = [4, 1], strides = [1, 1]} : vector<4x8xi32> to vector<4x1xi32>
    %43 = vector.broadcast %42 : vector<4x1xi32> to vector<4x32xi32>
    %44 = arith.cmpi eq, %9, %43 : vector<4x32xi32>
    %45 = arith.extui %44 : vector<4x32xi1> to vector<4x32xi32>
    %46 = arith.sitofp %45 : vector<4x32xi32> to vector<4x32xf32>
    %cst_13 = arith.constant dense<0.000000e+00> : vector<4x96xf32>
    %47 = tpu.matmul %46, %0, %cst_13 {dimension_numbers = #tpu.dot_dimension_numbers<[1], [0], [0], [1], [0, 0, 1, 1], [], []>} : vector<4x32xf32>, vector<32x96xf32>, vector<4x96xf32> -> vector<4x96xf32>
    %c1_i32 = arith.constant 1 : i32
    %48 = vector.broadcast %c1_i32 : i32 to vector<4x32xi32>
    %49 = arith.cmpi sgt, %8, %48 : vector<4x32xi32>
    %cst_14 = arith.constant dense<0.000000e+00> : vector<4x96xf32>
    %50 = tpu.matmul %39, %1, %cst_14 {dimension_numbers = #tpu.dot_dimension_numbers<[1], [0], [0], [1], [0, 0, 1, 1], [], []>} : vector<4x32xf32>, vector<32x96xf32>, vector<4x96xf32> -> vector<4x96xf32>
    %51 = vector.extract_strided_slice %47 {offsets = [0, 0], sizes = [4, 64], strides = [1, 1]} : vector<4x96xf32> to vector<4x64xf32>
    %52 = vector.extract_strided_slice %50 {offsets = [0, 0], sizes = [4, 64], strides = [1, 1]} : vector<4x96xf32> to vector<4x64xf32>
    %53 = arith.addf %51, %52 : vector<4x64xf32>
    %54 = arith.negf %53 : vector<4x64xf32>
    %55 = math.exp %54 : vector<4x64xf32>
    %cst_15 = arith.constant 1.000000e+00 : f32
    %56 = vector.broadcast %cst_15 : f32 to vector<4x64xf32>
    %57 = arith.addf %56, %55 : vector<4x64xf32>
    %58 = arith.divf %56, %57 : vector<4x64xf32>
    %59 = vector.extract_strided_slice %58 {offsets = [0, 0], sizes = [4, 32], strides = [1, 1]} : vector<4x64xf32> to vector<4x32xf32>
    %60 = vector.extract_strided_slice %58 {offsets = [0, 32], sizes = [4, 32], strides = [1, 1]} : vector<4x64xf32> to vector<4x32xf32>
    %61 = vector.extract_strided_slice %47 {offsets = [0, 64], sizes = [4, 32], strides = [1, 1]} : vector<4x96xf32> to vector<4x32xf32>
    %62 = vector.extract_strided_slice %50 {offsets = [0, 64], sizes = [4, 32], strides = [1, 1]} : vector<4x96xf32> to vector<4x32xf32>
    %63 = arith.addf %62, %5 : vector<4x32xf32>
    %64 = arith.mulf %59, %63 : vector<4x32xf32>
    %65 = arith.addf %61, %64 : vector<4x32xf32>
    %66 = math.tanh %65 : vector<4x32xf32>
    %67 = arith.subf %39, %66 : vector<4x32xf32>
    %68 = arith.mulf %60, %67 : vector<4x32xf32>
    %69 = arith.addf %66, %68 : vector<4x32xf32>
    %70 = arith.select %49, %69, %39 : vector<4x32xi1>, vector<4x32xf32>
    %cst_16 = arith.constant 0.000000e+00 : f32
    %71 = vector.broadcast %cst_16 : f32 to vector<4x32xf32>
    %72 = arith.select %49, %69, %71 : vector<4x32xi1>, vector<4x32xf32>
    %73 = vector.extract_strided_slice %2 {offsets = [0, 2], sizes = [4, 1], strides = [1, 1]} : vector<4x8xi32> to vector<4x1xi32>
    %74 = vector.broadcast %73 : vector<4x1xi32> to vector<4x32xi32>
    %75 = arith.cmpi eq, %9, %74 : vector<4x32xi32>
    %76 = arith.extui %75 : vector<4x32xi1> to vector<4x32xi32>
    %77 = arith.sitofp %76 : vector<4x32xi32> to vector<4x32xf32>
    %cst_17 = arith.constant dense<0.000000e+00> : vector<4x96xf32>
    %78 = tpu.matmul %77, %0, %cst_17 {dimension_numbers = #tpu.dot_dimension_numbers<[1], [0], [0], [1], [0, 0, 1, 1], [], []>} : vector<4x32xf32>, vector<32x96xf32>, vector<4x96xf32> -> vector<4x96xf32>
    %c2_i32 = arith.constant 2 : i32
    %79 = vector.broadcast %c2_i32 : i32 to vector<4x32xi32>
    %80 = arith.cmpi sgt, %8, %79 : vector<4x32xi32>
    %cst_18 = arith.constant dense<0.000000e+00> : vector<4x96xf32>
    %81 = tpu.matmul %70, %1, %cst_18 {dimension_numbers = #tpu.dot_dimension_numbers<[1], [0], [0], [1], [0, 0, 1, 1], [], []>} : vector<4x32xf32>, vector<32x96xf32>, vector<4x96xf32> -> vector<4x96xf32>
    %82 = vector.extract_strided_slice %78 {offsets = [0, 0], sizes = [4, 64], strides = [1, 1]} : vector<4x96xf32> to vector<4x64xf32>
    %83 = vector.extract_strided_slice %81 {offsets = [0, 0], sizes = [4, 64], strides = [1, 1]} : vector<4x96xf32> to vector<4x64xf32>
    %84 = arith.addf %82, %83 : vector<4x64xf32>
    %85 = arith.negf %84 : vector<4x64xf32>
    %86 = math.exp %85 : vector<4x64xf32>
    %cst_19 = arith.constant 1.000000e+00 : f32
    %87 = vector.broadcast %cst_19 : f32 to vector<4x64xf32>
    %88 = arith.addf %87, %86 : vector<4x64xf32>
    %89 = arith.divf %87, %88 : vector<4x64xf32>
    %90 = vector.extract_strided_slice %89 {offsets = [0, 0], sizes = [4, 32], strides = [1, 1]} : vector<4x64xf32> to vector<4x32xf32>
    %91 = vector.extract_strided_slice %89 {offsets = [0, 32], sizes = [4, 32], strides = [1, 1]} : vector<4x64xf32> to vector<4x32xf32>
    %92 = vector.extract_strided_slice %78 {offsets = [0, 64], sizes = [4, 32], strides = [1, 1]} : vector<4x96xf32> to vector<4x32xf32>
    %93 = vector.extract_strided_slice %81 {offsets = [0, 64], sizes = [4, 32], strides = [1, 1]} : vector<4x96xf32> to vector<4x32xf32>
    %94 = arith.addf %93, %5 : vector<4x32xf32>
    %95 = arith.mulf %90, %94 : vector<4x32xf32>
    %96 = arith.addf %92, %95 : vector<4x32xf32>
    %97 = math.tanh %96 : vector<4x32xf32>
    %98 = arith.subf %70, %97 : vector<4x32xf32>
    %99 = arith.mulf %91, %98 : vector<4x32xf32>
    %100 = arith.addf %97, %99 : vector<4x32xf32>
    %101 = arith.select %80, %100, %70 : vector<4x32xi1>, vector<4x32xf32>
    %cst_20 = arith.constant 0.000000e+00 : f32
    %102 = vector.broadcast %cst_20 : f32 to vector<4x32xf32>
    %103 = arith.select %80, %100, %102 : vector<4x32xi1>, vector<4x32xf32>
    %104 = vector.extract_strided_slice %2 {offsets = [0, 3], sizes = [4, 1], strides = [1, 1]} : vector<4x8xi32> to vector<4x1xi32>
    %105 = vector.broadcast %104 : vector<4x1xi32> to vector<4x32xi32>
    %106 = arith.cmpi eq, %9, %105 : vector<4x32xi32>
    %107 = arith.extui %106 : vector<4x32xi1> to vector<4x32xi32>
    %108 = arith.sitofp %107 : vector<4x32xi32> to vector<4x32xf32>
    %cst_21 = arith.constant dense<0.000000e+00> : vector<4x96xf32>
    %109 = tpu.matmul %108, %0, %cst_21 {dimension_numbers = #tpu.dot_dimension_numbers<[1], [0], [0], [1], [0, 0, 1, 1], [], []>} : vector<4x32xf32>, vector<32x96xf32>, vector<4x96xf32> -> vector<4x96xf32>
    %c3_i32 = arith.constant 3 : i32
    %110 = vector.broadcast %c3_i32 : i32 to vector<4x32xi32>
    %111 = arith.cmpi sgt, %8, %110 : vector<4x32xi32>
    %cst_22 = arith.constant dense<0.000000e+00> : vector<4x96xf32>
    %112 = tpu.matmul %101, %1, %cst_22 {dimension_numbers = #tpu.dot_dimension_numbers<[1], [0], [0], [1], [0, 0, 1, 1], [], []>} : vector<4x32xf32>, vector<32x96xf32>, vector<4x96xf32> -> vector<4x96xf32>
    %113 = vector.extract_strided_slice %109 {offsets = [0, 0], sizes = [4, 64], strides = [1, 1]} : vector<4x96xf32> to vector<4x64xf32>
    %114 = vector.extract_strided_slice %112 {offsets = [0, 0], sizes = [4, 64], strides = [1, 1]} : vector<4x96xf32> to vector<4x64xf32>
    %115 = arith.addf %113, %114 : vector<4x64xf32>
    %116 = arith.negf %115 : vector<4x64xf32>
    %117 = math.exp %116 : vector<4x64xf32>
    %cst_23 = arith.constant 1.000000e+00 : f32
    %118 = vector.broadcast %cst_23 : f32 to vector<4x64xf32>
    %119 = arith.addf %118, %117 : vector<4x64xf32>
    %120 = arith.divf %118, %119 : vector<4x64xf32>
    %121 = vector.extract_strided_slice %120 {offsets = [0, 0], sizes = [4, 32], strides = [1, 1]} : vector<4x64xf32> to vector<4x32xf32>
    %122 = vector.extract_strided_slice %120 {offsets = [0, 32], sizes = [4, 32], strides = [1, 1]} : vector<4x64xf32> to vector<4x32xf32>
    %123 = vector.extract_strided_slice %109 {offsets = [0, 64], sizes = [4, 32], strides = [1, 1]} : vector<4x96xf32> to vector<4x32xf32>
    %124 = vector.extract_strided_slice %112 {offsets = [0, 64], sizes = [4, 32], strides = [1, 1]} : vector<4x96xf32> to vector<4x32xf32>
    %125 = arith.addf %124, %5 : vector<4x32xf32>
    %126 = arith.mulf %121, %125 : vector<4x32xf32>
    %127 = arith.addf %123, %126 : vector<4x32xf32>
    %128 = math.tanh %127 : vector<4x32xf32>
    %129 = arith.subf %101, %128 : vector<4x32xf32>
    %130 = arith.mulf %122, %129 : vector<4x32xf32>
    %131 = arith.addf %128, %130 : vector<4x32xf32>
    %132 = arith.select %111, %131, %101 : vector<4x32xi1>, vector<4x32xf32>
    %cst_24 = arith.constant 0.000000e+00 : f32
    %133 = vector.broadcast %cst_24 : f32 to vector<4x32xf32>
    %134 = arith.select %111, %131, %133 : vector<4x32xi1>, vector<4x32xf32>
    %135 = vector.extract_strided_slice %2 {offsets = [0, 4], sizes = [4, 1], strides = [1, 1]} : vector<4x8xi32> to vector<4x1xi32>
    %136 = vector.broadcast %135 : vector<4x1xi32> to vector<4x32xi32>
    %137 = arith.cmpi eq, %9, %136 : vector<4x32xi32>
    %138 = arith.extui %137 : vector<4x32xi1> to vector<4x32xi32>
    %139 = arith.sitofp %138 : vector<4x32xi32> to vector<4x32xf32>
    %cst_25 = arith.constant dense<0.000000e+00> : vector<4x96xf32>
    %140 = tpu.matmul %139, %0, %cst_25 {dimension_numbers = #tpu.dot_dimension_numbers<[1], [0], [0], [1], [0, 0, 1, 1], [], []>} : vector<4x32xf32>, vector<32x96xf32>, vector<4x96xf32> -> vector<4x96xf32>
    %c4_i32 = arith.constant 4 : i32
    %141 = vector.broadcast %c4_i32 : i32 to vector<4x32xi32>
    %142 = arith.cmpi sgt, %8, %141 : vector<4x32xi32>
    %cst_26 = arith.constant dense<0.000000e+00> : vector<4x96xf32>
    %143 = tpu.matmul %132, %1, %cst_26 {dimension_numbers = #tpu.dot_dimension_numbers<[1], [0], [0], [1], [0, 0, 1, 1], [], []>} : vector<4x32xf32>, vector<32x96xf32>, vector<4x96xf32> -> vector<4x96xf32>
    %144 = vector.extract_strided_slice %140 {offsets = [0, 0], sizes = [4, 64], strides = [1, 1]} : vector<4x96xf32> to vector<4x64xf32>
    %145 = vector.extract_strided_slice %143 {offsets = [0, 0], sizes = [4, 64], strides = [1, 1]} : vector<4x96xf32> to vector<4x64xf32>
    %146 = arith.addf %144, %145 : vector<4x64xf32>
    %147 = arith.negf %146 : vector<4x64xf32>
    %148 = math.exp %147 : vector<4x64xf32>
    %cst_27 = arith.constant 1.000000e+00 : f32
    %149 = vector.broadcast %cst_27 : f32 to vector<4x64xf32>
    %150 = arith.addf %149, %148 : vector<4x64xf32>
    %151 = arith.divf %149, %150 : vector<4x64xf32>
    %152 = vector.extract_strided_slice %151 {offsets = [0, 0], sizes = [4, 32], strides = [1, 1]} : vector<4x64xf32> to vector<4x32xf32>
    %153 = vector.extract_strided_slice %151 {offsets = [0, 32], sizes = [4, 32], strides = [1, 1]} : vector<4x64xf32> to vector<4x32xf32>
    %154 = vector.extract_strided_slice %140 {offsets = [0, 64], sizes = [4, 32], strides = [1, 1]} : vector<4x96xf32> to vector<4x32xf32>
    %155 = vector.extract_strided_slice %143 {offsets = [0, 64], sizes = [4, 32], strides = [1, 1]} : vector<4x96xf32> to vector<4x32xf32>
    %156 = arith.addf %155, %5 : vector<4x32xf32>
    %157 = arith.mulf %152, %156 : vector<4x32xf32>
    %158 = arith.addf %154, %157 : vector<4x32xf32>
    %159 = math.tanh %158 : vector<4x32xf32>
    %160 = arith.subf %132, %159 : vector<4x32xf32>
    %161 = arith.mulf %153, %160 : vector<4x32xf32>
    %162 = arith.addf %159, %161 : vector<4x32xf32>
    %163 = arith.select %142, %162, %132 : vector<4x32xi1>, vector<4x32xf32>
    %cst_28 = arith.constant 0.000000e+00 : f32
    %164 = vector.broadcast %cst_28 : f32 to vector<4x32xf32>
    %165 = arith.select %142, %162, %164 : vector<4x32xi1>, vector<4x32xf32>
    %166 = vector.extract_strided_slice %2 {offsets = [0, 5], sizes = [4, 1], strides = [1, 1]} : vector<4x8xi32> to vector<4x1xi32>
    %167 = vector.broadcast %166 : vector<4x1xi32> to vector<4x32xi32>
    %168 = arith.cmpi eq, %9, %167 : vector<4x32xi32>
    %169 = arith.extui %168 : vector<4x32xi1> to vector<4x32xi32>
    %170 = arith.sitofp %169 : vector<4x32xi32> to vector<4x32xf32>
    %cst_29 = arith.constant dense<0.000000e+00> : vector<4x96xf32>
    %171 = tpu.matmul %170, %0, %cst_29 {dimension_numbers = #tpu.dot_dimension_numbers<[1], [0], [0], [1], [0, 0, 1, 1], [], []>} : vector<4x32xf32>, vector<32x96xf32>, vector<4x96xf32> -> vector<4x96xf32>
    %c5_i32 = arith.constant 5 : i32
    %172 = vector.broadcast %c5_i32 : i32 to vector<4x32xi32>
    %173 = arith.cmpi sgt, %8, %172 : vector<4x32xi32>
    %cst_30 = arith.constant dense<0.000000e+00> : vector<4x96xf32>
    %174 = tpu.matmul %163, %1, %cst_30 {dimension_numbers = #tpu.dot_dimension_numbers<[1], [0], [0], [1], [0, 0, 1, 1], [], []>} : vector<4x32xf32>, vector<32x96xf32>, vector<4x96xf32> -> vector<4x96xf32>
    %175 = vector.extract_strided_slice %171 {offsets = [0, 0], sizes = [4, 64], strides = [1, 1]} : vector<4x96xf32> to vector<4x64xf32>
    %176 = vector.extract_strided_slice %174 {offsets = [0, 0], sizes = [4, 64], strides = [1, 1]} : vector<4x96xf32> to vector<4x64xf32>
    %177 = arith.addf %175, %176 : vector<4x64xf32>
    %178 = arith.negf %177 : vector<4x64xf32>
    %179 = math.exp %178 : vector<4x64xf32>
    %cst_31 = arith.constant 1.000000e+00 : f32
    %180 = vector.broadcast %cst_31 : f32 to vector<4x64xf32>
    %181 = arith.addf %180, %179 : vector<4x64xf32>
    %182 = arith.divf %180, %181 : vector<4x64xf32>
    %183 = vector.extract_strided_slice %182 {offsets = [0, 0], sizes = [4, 32], strides = [1, 1]} : vector<4x64xf32> to vector<4x32xf32>
    %184 = vector.extract_strided_slice %182 {offsets = [0, 32], sizes = [4, 32], strides = [1, 1]} : vector<4x64xf32> to vector<4x32xf32>
    %185 = vector.extract_strided_slice %171 {offsets = [0, 64], sizes = [4, 32], strides = [1, 1]} : vector<4x96xf32> to vector<4x32xf32>
    %186 = vector.extract_strided_slice %174 {offsets = [0, 64], sizes = [4, 32], strides = [1, 1]} : vector<4x96xf32> to vector<4x32xf32>
    %187 = arith.addf %186, %5 : vector<4x32xf32>
    %188 = arith.mulf %183, %187 : vector<4x32xf32>
    %189 = arith.addf %185, %188 : vector<4x32xf32>
    %190 = math.tanh %189 : vector<4x32xf32>
    %191 = arith.subf %163, %190 : vector<4x32xf32>
    %192 = arith.mulf %184, %191 : vector<4x32xf32>
    %193 = arith.addf %190, %192 : vector<4x32xf32>
    %194 = arith.select %173, %193, %163 : vector<4x32xi1>, vector<4x32xf32>
    %cst_32 = arith.constant 0.000000e+00 : f32
    %195 = vector.broadcast %cst_32 : f32 to vector<4x32xf32>
    %196 = arith.select %173, %193, %195 : vector<4x32xi1>, vector<4x32xf32>
    %197 = vector.extract_strided_slice %2 {offsets = [0, 6], sizes = [4, 1], strides = [1, 1]} : vector<4x8xi32> to vector<4x1xi32>
    %198 = vector.broadcast %197 : vector<4x1xi32> to vector<4x32xi32>
    %199 = arith.cmpi eq, %9, %198 : vector<4x32xi32>
    %200 = arith.extui %199 : vector<4x32xi1> to vector<4x32xi32>
    %201 = arith.sitofp %200 : vector<4x32xi32> to vector<4x32xf32>
    %cst_33 = arith.constant dense<0.000000e+00> : vector<4x96xf32>
    %202 = tpu.matmul %201, %0, %cst_33 {dimension_numbers = #tpu.dot_dimension_numbers<[1], [0], [0], [1], [0, 0, 1, 1], [], []>} : vector<4x32xf32>, vector<32x96xf32>, vector<4x96xf32> -> vector<4x96xf32>
    %c6_i32 = arith.constant 6 : i32
    %203 = vector.broadcast %c6_i32 : i32 to vector<4x32xi32>
    %204 = arith.cmpi sgt, %8, %203 : vector<4x32xi32>
    %cst_34 = arith.constant dense<0.000000e+00> : vector<4x96xf32>
    %205 = tpu.matmul %194, %1, %cst_34 {dimension_numbers = #tpu.dot_dimension_numbers<[1], [0], [0], [1], [0, 0, 1, 1], [], []>} : vector<4x32xf32>, vector<32x96xf32>, vector<4x96xf32> -> vector<4x96xf32>
    %206 = vector.extract_strided_slice %202 {offsets = [0, 0], sizes = [4, 64], strides = [1, 1]} : vector<4x96xf32> to vector<4x64xf32>
    %207 = vector.extract_strided_slice %205 {offsets = [0, 0], sizes = [4, 64], strides = [1, 1]} : vector<4x96xf32> to vector<4x64xf32>
    %208 = arith.addf %206, %207 : vector<4x64xf32>
    %209 = arith.negf %208 : vector<4x64xf32>
    %210 = math.exp %209 : vector<4x64xf32>
    %cst_35 = arith.constant 1.000000e+00 : f32
    %211 = vector.broadcast %cst_35 : f32 to vector<4x64xf32>
    %212 = arith.addf %211, %210 : vector<4x64xf32>
    %213 = arith.divf %211, %212 : vector<4x64xf32>
    %214 = vector.extract_strided_slice %213 {offsets = [0, 0], sizes = [4, 32], strides = [1, 1]} : vector<4x64xf32> to vector<4x32xf32>
    %215 = vector.extract_strided_slice %213 {offsets = [0, 32], sizes = [4, 32], strides = [1, 1]} : vector<4x64xf32> to vector<4x32xf32>
    %216 = vector.extract_strided_slice %202 {offsets = [0, 64], sizes = [4, 32], strides = [1, 1]} : vector<4x96xf32> to vector<4x32xf32>
    %217 = vector.extract_strided_slice %205 {offsets = [0, 64], sizes = [4, 32], strides = [1, 1]} : vector<4x96xf32> to vector<4x32xf32>
    %218 = arith.addf %217, %5 : vector<4x32xf32>
    %219 = arith.mulf %214, %218 : vector<4x32xf32>
    %220 = arith.addf %216, %219 : vector<4x32xf32>
    %221 = math.tanh %220 : vector<4x32xf32>
    %222 = arith.subf %194, %221 : vector<4x32xf32>
    %223 = arith.mulf %215, %222 : vector<4x32xf32>
    %224 = arith.addf %221, %223 : vector<4x32xf32>
    %225 = arith.select %204, %224, %194 : vector<4x32xi1>, vector<4x32xf32>
    %cst_36 = arith.constant 0.000000e+00 : f32
    %226 = vector.broadcast %cst_36 : f32 to vector<4x32xf32>
    %227 = arith.select %204, %224, %226 : vector<4x32xi1>, vector<4x32xf32>
    %228 = vector.extract_strided_slice %2 {offsets = [0, 7], sizes = [4, 1], strides = [1, 1]} : vector<4x8xi32> to vector<4x1xi32>
    %229 = vector.broadcast %228 : vector<4x1xi32> to vector<4x32xi32>
    %230 = arith.cmpi eq, %9, %229 : vector<4x32xi32>
    %231 = arith.extui %230 : vector<4x32xi1> to vector<4x32xi32>
    %232 = arith.sitofp %231 : vector<4x32xi32> to vector<4x32xf32>
    %cst_37 = arith.constant dense<0.000000e+00> : vector<4x96xf32>
    %233 = tpu.matmul %232, %0, %cst_37 {dimension_numbers = #tpu.dot_dimension_numbers<[1], [0], [0], [1], [0, 0, 1, 1], [], []>} : vector<4x32xf32>, vector<32x96xf32>, vector<4x96xf32> -> vector<4x96xf32>
    %c7_i32 = arith.constant 7 : i32
    %234 = vector.broadcast %c7_i32 : i32 to vector<4x32xi32>
    %235 = arith.cmpi sgt, %8, %234 : vector<4x32xi32>
    %cst_38 = arith.constant dense<0.000000e+00> : vector<4x96xf32>
    %236 = tpu.matmul %225, %1, %cst_38 {dimension_numbers = #tpu.dot_dimension_numbers<[1], [0], [0], [1], [0, 0, 1, 1], [], []>} : vector<4x32xf32>, vector<32x96xf32>, vector<4x96xf32> -> vector<4x96xf32>
    %237 = vector.extract_strided_slice %233 {offsets = [0, 0], sizes = [4, 64], strides = [1, 1]} : vector<4x96xf32> to vector<4x64xf32>
    %238 = vector.extract_strided_slice %236 {offsets = [0, 0], sizes = [4, 64], strides = [1, 1]} : vector<4x96xf32> to vector<4x64xf32>
    %239 = arith.addf %237, %238 : vector<4x64xf32>
    %240 = arith.negf %239 : vector<4x64xf32>
    %241 = math.exp %240 : vector<4x64xf32>
    %cst_39 = arith.constant 1.000000e+00 : f32
    %242 = vector.broadcast %cst_39 : f32 to vector<4x64xf32>
    %243 = arith.addf %242, %241 : vector<4x64xf32>
    %244 = arith.divf %242, %243 : vector<4x64xf32>
    %245 = vector.extract_strided_slice %244 {offsets = [0, 0], sizes = [4, 32], strides = [1, 1]} : vector<4x64xf32> to vector<4x32xf32>
    %246 = vector.extract_strided_slice %244 {offsets = [0, 32], sizes = [4, 32], strides = [1, 1]} : vector<4x64xf32> to vector<4x32xf32>
    %247 = vector.extract_strided_slice %233 {offsets = [0, 64], sizes = [4, 32], strides = [1, 1]} : vector<4x96xf32> to vector<4x32xf32>
    %248 = vector.extract_strided_slice %236 {offsets = [0, 64], sizes = [4, 32], strides = [1, 1]} : vector<4x96xf32> to vector<4x32xf32>
    %249 = arith.addf %248, %5 : vector<4x32xf32>
    %250 = arith.mulf %245, %249 : vector<4x32xf32>
    %251 = arith.addf %247, %250 : vector<4x32xf32>
    %252 = math.tanh %251 : vector<4x32xf32>
    %253 = arith.subf %225, %252 : vector<4x32xf32>
    %254 = arith.mulf %246, %253 : vector<4x32xf32>
    %255 = arith.addf %252, %254 : vector<4x32xf32>
    %256 = arith.select %235, %255, %225 : vector<4x32xi1>, vector<4x32xf32>
    %cst_40 = arith.constant 0.000000e+00 : f32
    %257 = vector.broadcast %cst_40 : f32 to vector<4x32xf32>
    %258 = arith.select %235, %255, %257 : vector<4x32xi1>, vector<4x32xf32>
    %259 = tpu.concatenate %41, %72, %103, %134, %165, %196, %227, %258 in 1 : vector<4x32xf32>, vector<4x32xf32>, vector<4x32xf32>, vector<4x32xf32>, vector<4x32xf32>, vector<4x32xf32>, vector<4x32xf32>, vector<4x32xf32> -> vector<4x256xf32>
    %c0_41 = arith.constant 0 : index
    %c0_42 = arith.constant 0 : index
    %260 = vector.load %arg5[%c0_41, %c0_42] : memref<4x256xf32, #tpu.memory_space<vmem>>, vector<4x256xf32>
    tpu.vector_store %arg5[%c0_41, %c0_42], %259 {strides = array<i32>} : memref<4x256xf32, #tpu.memory_space<vmem>>, vector<4x256xf32>,
    %c0_43 = arith.constant 0 : index
    %c0_44 = arith.constant 0 : index
    %261 = vector.load %arg6[%c0_43, %c0_44] : memref<4x32xf32, #tpu.memory_space<vmem>>, vector<4x32xf32>
    tpu.vector_store %arg6[%c0_43, %c0_44], %256 {strides = array<i32>} : memref<4x32xf32, #tpu.memory_space<vmem>>, vector<4x32xf32>,
    return
  }
}

</mosaic_0001>

<bundles_post_ra>
// kernel: encoder_forward.1
= control target key start
LH: loop header
LB: loop body
LE: loop exit
PB: predicated region body
PF: predicated region fallthrough
CT: control target
= control target key end

     0   :  { %12 = vsyncpa [#allocation3], 0  ;;  %s2499_s0 = inlined_call_operand.hbm [shape: f32[32,96], index: 0, kind: input, shape index: {}]   ;;  %s2500_s1 = inlined_call_operand.hbm [shape: f32[32,96], index: 1, kind: input, shape index: {}]   ;;  %s2501_s2 = inlined_call_operand.vmem [shape: f32[1,32], index: 2, kind: input, shape index: {}]   ;;  %s2502_s3 = inlined_call_operand.vmem [shape: s32[4,8], index: 3, kind: input, shape index: {}]   ;;  %s2503_s4 = inlined_call_operand.vmem [shape: s32[4,1], index: 4, kind: input, shape index: {}]   ;;  %s2504_s5 = inlined_call_operand.vmem [shape: f32[4,256], index: 5, kind: output, shape index: {0}]   ;;  %s2505_s6 = inlined_call_operand.hbm [shape: f32[4,32], index: 6, kind: output, shape index: {1}]  }
   0x1   :  { %13 = vsyncpa [#allocation6], 0 }
   0x2   :  { %14 = vsyncpa [#allocation4], 0  ;;  %s2162_s21 = smov [#allocation2]   ;;  %s2090_s25 = scalar_lea.hbm %s2499_s0, 512 }
   0x3   :  { %s20_s22 = sshll.u32 %s2162_s21, 4  ;;  %p2091_p0 = scmp.ne.s32.totalorder %s2499_s0, %s2090_s25  ;;  %s21_s22 = int_to_ptr.vmem [resolvable:$true] %s20_s22 }
   0x4   :  { %p2094_p1 = scmp.lt.u32.totalorder %s2090_s25, %s2499_s0 }
   0x6   :  { %p2096_p2 = pnand %p2094_p1, %p2091_p0 }
   0x8   :  { %2099 = shalt.err (!%p2096_p2)
}
   0x9   :  { %s2100_s30 = scalar_lea.vmem %s21_s22, 512  ;;  %p2105_p4 = scmp.lt.s32.totalorder %s21_s22, %s21_s22 }
   0xa   :  { %p2101_p3 = scmp.ne.s32.totalorder %s21_s22, %s2100_s30  ;;  %p2106_p5 = scmp.lt.s32.totalorder %s2100_s30, %s2100_s30 }
   0xc   :  { %p2107_p6 = por %p2106_p5, %p2105_p4 }
   0xe   :  { %p2108_p7 = pnand %p2107_p6, %p2101_p3 }
  0x10   :  { %2111 = shalt.err (!%p2108_p7)
}
  0x11   :  { %s2163_s7 = smov 128   ;;  %s2164_s8 = smov 8  }
  0x12   :  { %26 = dma.hbm_to_vmem [thread:$0]  %s2499_s0, 512, %s21_s22, [#allocation3], %s2163_s7, %s2163_s7, %s2164_s8  }
  0x13   :  { %s2165_s11 = smov [#allocation5]   ;;  %s2112_s15 = scalar_lea.hbm %s2500_s1, 512 }
  0x14   :  { %s32_s12 = sshll.u32 %s2165_s11, 4  ;;  %p2113_p8 = scmp.ne.s32.totalorder %s2500_s1, %s2112_s15  ;;  %s33_s12 = int_to_ptr.vmem [resolvable:$true] %s32_s12 }
  0x15   :  { %p2116_p9 = scmp.lt.u32.totalorder %s2112_s15, %s2500_s1 }
  0x17   :  { %p2118_p10 = pnand %p2116_p9, %p2113_p8 }
  0x19   :  { %2121 = shalt.err (!%p2118_p10)
}
  0x1a   :  { %s2122_s20 = scalar_lea.vmem %s33_s12, 512  ;;  %p2127_p12 = scmp.lt.s32.totalorder %s33_s12, %s33_s12 }
  0x1b   :  { %p2123_p11 = scmp.ne.s32.totalorder %s33_s12, %s2122_s20  ;;  %p2128_p13 = scmp.lt.s32.totalorder %s2122_s20, %s2122_s20 }
  0x1d   :  { %p2129_p0 = por %p2128_p13, %p2127_p12 }
  0x1f   :  { %p2130_p1 = pnand %p2129_p0, %p2123_p11 }
  0x21   :  { %2133 = shalt.err (!%p2130_p1)
}
  0x22   :  { %38 = dma.hbm_to_vmem [thread:$0]  %s2500_s1, 512, %s33_s12, [#allocation6], %s2163_s7, %s2163_s7, %s2164_s8  }
  0x23   :  { %2156 = dma.done.wait [#allocation3], 512  }
  0x24   :  { %2157 = vsyncadd [#allocation3], 4294966784 }
  0x25   :  { %2158 = dma.done.wait [#allocation6], 512  }
  0x26   :  { %2159 = vsyncadd [#allocation6], 4294966784  ;;  %v2166_v0 = vmov 0   ;;  %v2167_v1 = vmov 0.0|0.0   ;;  %vm2168_vm0 = vmmov 0   ;;  %v2169_v2 = vmov 0.0  }
  0x27   :  { %2032 = vset.pattern.permute.xlu0 %v2166_v0  ;;  %1923 = vmatprep.subr.bf16.mxu1 %v2167_v1  ;;  %v2249_v3 = vld [vmem:[%s2502_s3] sm:$0xf]  ;;  %v56_v5 = vld [vmem:[#allocation5 + $0x8] sm:$0xff]  ;;  %v57_v7 = vld [vmem:[#allocation5 + $0x10] sm:$0xff]  ;;  %s2170_s24 = smov 64   ;;  %v70_v17 = vlaneseq  ;;  %vm78_vm1 = vcmask 261120  }
  0x28   :  { %1760 = vmatprep.mubr.msk.f32.mxu1 %vm2168_vm0, %v2169_v2  ;;  %1917 = vmatprep.subr.bf16.mxu0 %v2167_v1  ;;  %v55_v4 = vld [vmem:[#allocation5] sm:$0xff]  ;;  %v58_v8 = vld [vmem:[#allocation5 + $0x18] sm:$0xff]  ;;  %v52_v10 = vld [vmem:[#allocation2 + $0x8] sm:$0xff]  ;;  %v2171_v37 = vmov 1   ;;  %s2172_s26 = smov 96   ;;  %s2173_s27 = smov 32  }
  0x29   :  { %1749 = vmatprep.mubr.msk.f32.mxu0 %vm2168_vm0, %v2169_v2  ;;  %2033 = vset.pattern.permute.xlu1 %v2166_v0  ;;  %v2252_v6 = vpack.c.bf16 %v56_v5, %v55_v4  ;;  %v51_v9 = vld [vmem:[#allocation2] sm:$0xff]  ;;  %v53_v11 = vld [vmem:[#allocation2 + $0x10] sm:$0xff]  ;;  %v54_v12 = vld [vmem:[#allocation2 + $0x18] sm:$0xff]  ;;  %v2255_v13 = vpack.c.bf16 %v58_v8, %v57_v7  ;;  %v2279_v18 = vand.u32 127, %v70_v17  ;;  %v2174_v63 = vmov 2  }
  0x2a   :  { %73 = vperm.xlu0 %2032, %v2249_v3   ;;  %v2257_v14 = vpack.c.bf16 %v52_v10, %v51_v9  ;;  %v1629_v15 = vld [vmem:[%s2501_s2] ss:$0 sm:$0xff]  ;;  %v2264_v16 = vpack.c.bf16 %v54_v12, %v53_v11 }
  0x2b   :  { %1925 = vmatpush3.bf16.msra.mxu1 %v2252_v6  ;;  %v66_v34 = vld [vmem:[%s2503_s4] sm:$0xf]  ;;  %s2180_s4 = smov [#allocation7]  }
  0x2c   :  { %1926 = vmatprep.subr.bf16.mxu1 %v2167_v1  ;;  %1919 = vmatpush3.bf16.msra.mxu0 %v2257_v14  ;;  %s1617_s28 = sshll.u32 %s2180_s4, 4  ;;  %s1618_s28 = int_to_ptr.vmem [resolvable:$true] %s1617_s28 }
  0x2d   :  { %1920 = vmatprep.subr.bf16.mxu0 %v2167_v1  ;;  %s2134_s29 = scalar_lea.vmem %s1618_s28, 64  ;;  %p2139_p3 = scmp.lt.s32.totalorder %s1618_s28, %s1618_s28 }
  0x2e   :  { %233 = vrot.lane.b32.xlu0 %v1629_v15, %s2170_s24  ;;  %p2135_p2 = scmp.ne.s32.totalorder %s1618_s28, %s2134_s29  ;;  %p2140_p4 = scmp.lt.s32.totalorder %s2134_s29, %s2134_s29 }
  0x2f   :  { %1928 = vmatpush3.bf16.msra.mxu1 %v2255_v13  ;;  %2034 = vset.pattern.permute.xlu0 %v2171_v37 }
  0x30   :  { %1935 = vmatprep.subr.bf16.mxu1 %v2167_v1  ;;  %1922 = vmatpush3.bf16.msra.mxu0 %v2264_v16  ;;  %p2141_p5 = por %p2140_p4, %p2139_p3 }
  0x31   :  { %1929 = vmatprep.subr.bf16.mxu0 %v2167_v1 }
  0x32   :  { %1761 = vmatmul.mubr.f32.vlgmr.msra.gmra.mrb[0].mxu1 %v2169_v2  ;;  %p2142_p6 = pnand %p2141_p5, %p2135_p2 }
  0x33   :  { %1937 = vmatpush3.bf16.msra.mxu1 %v2252_v6  ;;  %1782 = vmatprep.mubr.msk.f32.mxu1 %vm2168_vm0, %v2169_v2 }
  0x34   :  { %1938 = vmatprep.subr.bf16.mxu1 %v2167_v1 }
  0x37   :  { %1940 = vmatpush3.bf16.msra.mxu1 %v2255_v13 }
  0x38   :  { %1947 = vmatprep.subr.bf16.mxu1 %v2167_v1 }
  0xa9   :  { %v74_v19 = vpop.permute.xlu0 %73 }
  0xaa   :  { %vm75_vm2 = vcmp.eq.s32.totalorder %v2279_v18, %v74_v19 }
  0xab   :  { %v1630_v20 = vsel %vm75_vm2, 1.0, %v2169_v2 }
  0xac   :  { %1750 = vmatmul.mubr.msk.f32.vlgmr.msra.gmra.mrb[0].mxu0 %vm78_vm1, %v1630_v20 }
  0xad   :  { %1931 = vmatpush3.bf16.msra.mxu0 %v2257_v14  ;;  %1771 = vmatprep.mubr.msk.f32.mxu0 %vm2168_vm0, %v2169_v2  ;;  %v2290_v21 = vpop.permute.xlu0 %233 }
  0xae   :  { %1932 = vmatprep.subr.bf16.mxu0 %v2167_v1 }
  0xb1   :  { %1934 = vmatpush3.bf16.msra.mxu0 %v2264_v16 }
  0xb2   :  { %1941 = vmatprep.subr.bf16.mxu0 %v2167_v1 }
 0x105   :  { %v222_v22 = vpop.f32.mrb[0].mxu1 }
 0x106   :  { %v1762_v23 = vpop.f32.mrb[1].mxu1  ;;  %v236_v24 = vadd.f32 %v2290_v21, %v222_v22 }
 0x108   :  { %238 = vrot.lane.b32.xlu1 %v236_v24, %s2170_s24 }
 0x17a   :  { %v239_v31 = vpop.permute.xlu1 %238 }
 0x17f   :  { %v148_v25 = vpop.f32.mrb[0].mxu0 }
 0x180   :  { %v226_v26 = vadd.f32 %v222_v22, %v148_v25  ;;  %v1751_v27 = vpop.f32.mrb[1].mxu0 }
 0x182   :  { %v1632_v28 = vmul.f32 -1.442695, %v226_v26 }
 0x184   :  { %2042 = vpow2.f32 %v1632_v28 }
 0x18e   :  { %v2043_v29 = vpop.eup %2042 }
 0x18f   :  { %v230_v30 = vadd.f32 1.0, %v2043_v29 }
 0x191   :  { %2044 = vrcp.f32 %v230_v30 }
 0x19b   :  { %v2045_v32 = vpop.eup %2044 }
 0x19c   :  { %v241_v33 = vmul.f32 %v2045_v32, %v239_v31 }
 0x19e   :  { %243 = vrot.lane.b32.xlu1 %v241_v33, %s2170_s24 }
 0x1a2   :  { %68 = vperm.xlu1 %2033, %v66_v34   ;;  %v2175_v34 = vmov 3  }
 0x1a6   :  { %2035 = vset.pattern.permute.xlu1 %v2174_v63 }
 0x210   :  { %v244_v35 = vpop.permute.xlu1 %243 }
 0x211   :  { %v246_v36 = vadd.f32 %v244_v35, %v148_v25 }
 0x213   :  { %2046 = vtanh.f32 %v246_v36 }
 0x21d   :  { %v2047_v38 = vpop.eup %2046 }
 0x21e   :  { %v248_v39 = vsub.f32 0.0, %v2047_v38 }
 0x220   :  { %250 = vrot.lane.b32.xlu0 %v248_v39, %s2172_s26 }
 0x221   :  { %v2301_v42 = vpop.permute.xlu1 %68 }
 0x222   :  { %vm152_vm3 = vcmp.gt.s32.totalorder %v2301_v42, 0  ;;  %vm339_vm5 = vcmp.gt.s32.totalorder %v2301_v42, 1  ;;  %vm526_vm7 = vcmp.gt.s32.totalorder %v2301_v42, 2  ;;  %vm713_vm9 = vcmp.gt.s32.totalorder %v2301_v42, 3 }
 0x223   :  { %vm900_vm11 = vcmp.gt.s32.totalorder %v2301_v42, 4  ;;  %vm1087_vm13 = vcmp.gt.s32.totalorder %v2301_v42, 5  ;;  %vm1274_vm15 = vcmp.gt.s32.totalorder %v2301_v42, 6  ;;  %vm1461_vm2 = vcmp.gt.s32.totalorder %v2301_v42, 7 }
 0x292   :  { %v251_v40 = vpop.permute.xlu0 %250 }
 0x293   :  { %v253_v41 = vmul.f32 %v2045_v32, %v251_v40 }
 0x295   :  { %255 = vrot.lane.b32.xlu0 %v253_v41, %s2173_s27 }
 0x299   :  { %261 = vperm.xlu0 %2034, %v2249_v3  }
 0x307   :  { %v256_v43 = vpop.permute.xlu0 %255 }
 0x308   :  { %v258_v44 = vadd.f32 %v2047_v38, %v256_v43 }
 0x30a   :  { %v259_v45 = vsel %vm152_vm3, %v258_v44, 0.0  ;;  %vm1591_vm3 = vcmask 523264  }
 0x30b   :  { %341 = vrot.lane.b32.xlu1 %v259_v45, %s2170_s24 }
 0x318   :  { %v262_v46 = vpop.permute.xlu0 %261 }
 0x319   :  { %vm263_vm4 = vcmp.eq.s32.totalorder %v2279_v18, %v262_v46 }
 0x31a   :  { %v1633_v47 = vsel %vm263_vm4, 1.0, %v2169_v2  ;;  %vm1593_vm4 = vcmask 785408  }
 0x31b   :  { %1772 = vmatmul.mubr.msk.f32.vlgmr.msra.gmra.mrb[2].mxu0 %vm78_vm1, %v1633_v47 }
 0x31c   :  { %1943 = vmatpush3.bf16.msra.mxu0 %v2257_v14  ;;  %1793 = vmatprep.mubr.msk.f32.mxu0 %vm2168_vm0, %v2169_v2 }
 0x31d   :  { %1944 = vmatprep.subr.bf16.mxu0 %v2167_v1 }
 0x320   :  { %1946 = vmatpush3.bf16.msra.mxu0 %v2264_v16 }
 0x321   :  { %1953 = vmatprep.subr.bf16.mxu0 %v2167_v1 }
 0x37d   :  { %v2314_v48 = vpop.permute.xlu1 %341 }
 0x37e   :  { %1783 = vmatmul.mubr.msk.f32.vlgmr.msra.gmra.mrb[2].mxu1 %vm78_vm1, %v2314_v48 }
 0x37f   :  { %1949 = vmatpush3.bf16.msra.mxu1 %v2252_v6  ;;  %1804 = vmatprep.mubr.msk.f32.mxu1 %vm2168_vm0, %v2169_v2 }
 0x380   :  { %1950 = vmatprep.subr.bf16.mxu1 %v2167_v1 }
 0x383   :  { %1952 = vmatpush3.bf16.msra.mxu1 %v2255_v13 }
 0x384   :  { %1959 = vmatprep.subr.bf16.mxu1 %v2167_v1 }
 0x3ee   :  { %v335_v49 = vpop.f32.mrb[2].mxu0 }
 0x3ef   :  { %v1773_v50 = vpop.f32.mrb[3].mxu0 }
 0x451   :  { %v411_v51 = vpop.f32.mrb[2].mxu1 }
 0x452   :  { %v415_v52 = vadd.f32 %v411_v51, %v335_v49  ;;  %v422_v53 = vadd.f32 %v411_v51, %v2290_v21  ;;  %v1784_v54 = vpop.f32.mrb[3].mxu1 }
 0x454   :  { %424 = vrot.lane.b32.xlu1 %v422_v53, %s2170_s24  ;;  %v1636_v55 = vmul.f32 -1.442695, %v415_v52 }
 0x456   :  { %2048 = vpow2.f32 %v1636_v55 }
 0x460   :  { %v2049_v56 = vpop.eup %2048 }
 0x461   :  { %v419_v57 = vadd.f32 1.0, %v2049_v56 }
 0x463   :  { %2050 = vrcp.f32 %v419_v57 }
 0x46d   :  { %v2051_v58 = vpop.eup %2050 }
 0x4c6   :  { %v425_v59 = vpop.permute.xlu1 %424 }
 0x4c7   :  { %v427_v60 = vmul.f32 %v2051_v58, %v425_v59 }
 0x4c9   :  { %429 = vrot.lane.b32.xlu1 %v427_v60, %s2170_s24 }
 0x53b   :  { %v430_v61 = vpop.permute.xlu1 %429 }
 0x53c   :  { %v432_v62 = vadd.f32 %v430_v61, %v335_v49 }
 0x53e   :  { %2052 = vtanh.f32 %v432_v62  ;;  %v2176_v62 = vmov 4  }
 0x548   :  { %v2053_v0 = vpop.eup %2052 }
 0x549   :  { %v434_v4 = vsub.f32 %v259_v45, %v2053_v0 }
 0x54b   :  { %436 = vrot.lane.b32.xlu0 %v434_v4, %s2172_s26 }
 0x5bd   :  { %v437_v5 = vpop.permute.xlu0 %436 }
 0x5be   :  { %v439_v7 = vmul.f32 %v2051_v58, %v437_v5 }
 0x5c0   :  { %441 = vrot.lane.b32.xlu1 %v439_v7, %s2173_s27 }
 0x5c4   :  { %448 = vperm.xlu1 %2035, %v2249_v3  }
 0x5c8   :  { %2036 = vset.pattern.permute.xlu1 %v2175_v34  ;;  %v2177_v34 = vmov 5  }
 0x632   :  { %v442_v8 = vpop.permute.xlu1 %441 }
 0x633   :  { %v444_v9 = vadd.f32 %v2053_v0, %v442_v8 }
 0x635   :  { %v445_v10 = vsel %vm339_vm5, %v444_v9, %v259_v45  ;;  %v2331_v11 = vsel %vm339_vm5, %v444_v9, 0.0  ;;  %vm1607_vm5 = vcmask 257024  }
 0x636   :  { %528 = vrot.lane.b32.xlu0 %v445_v10, %s2170_s24 }
 0x643   :  { %v449_v12 = vpop.permute.xlu1 %448 }
 0x644   :  { %vm450_vm6 = vcmp.eq.s32.totalorder %v2279_v18, %v449_v12 }
 0x645   :  { %v1637_v15 = vsel %vm450_vm6, 1.0, %v2169_v2 }
 0x646   :  { %1794 = vmatmul.mubr.msk.f32.vlgmr.msra.gmra.mrb[4].mxu0 %vm78_vm1, %v1637_v15 }
 0x647   :  { %1955 = vmatpush3.bf16.msra.mxu0 %v2257_v14  ;;  %1815 = vmatprep.mubr.msk.f32.mxu0 %vm2168_vm0, %v2169_v2 }
 0x648   :  { %1956 = vmatprep.subr.bf16.mxu0 %v2167_v1 }
 0x64b   :  { %1958 = vmatpush3.bf16.msra.mxu0 %v2264_v16 }
 0x64c   :  { %1965 = vmatprep.subr.bf16.mxu0 %v2167_v1 }
 0x6a8   :  { %v529_v17 = vpop.permute.xlu0 %528 }
 0x6a9   :  { %1805 = vmatmul.mubr.msk.f32.vlgmr.msra.gmra.mrb[4].mxu1 %vm78_vm1, %v529_v17 }
 0x6aa   :  { %1961 = vmatpush3.bf16.msra.mxu1 %v2252_v6  ;;  %1826 = vmatprep.mubr.msk.f32.mxu1 %vm2168_vm0, %v2169_v2 }
 0x6ab   :  { %1962 = vmatprep.subr.bf16.mxu1 %v2167_v1 }
 0x6ae   :  { %1964 = vmatpush3.bf16.msra.mxu1 %v2255_v13 }
 0x6af   :  { %1971 = vmatprep.subr.bf16.mxu1 %v2167_v1 }
 0x719   :  { %v522_v19 = vpop.f32.mrb[4].mxu0 }
 0x71a   :  { %v1795_v20 = vpop.f32.mrb[5].mxu0 }
 0x77c   :  { %v598_v22 = vpop.f32.mrb[4].mxu1 }
 0x77d   :  { %v602_v23 = vadd.f32 %v598_v22, %v522_v19  ;;  %v609_v24 = vadd.f32 %v598_v22, %v2290_v21  ;;  %v1806_v25 = vpop.f32.mrb[5].mxu1 }
 0x77f   :  { %611 = vrot.lane.b32.xlu0 %v609_v24, %s2170_s24  ;;  %v1640_v26 = vmul.f32 -1.442695, %v602_v23 }
 0x781   :  { %2054 = vpow2.f32 %v1640_v26 }
 0x78b   :  { %v2055_v27 = vpop.eup %2054 }
 0x78c   :  { %v606_v28 = vadd.f32 1.0, %v2055_v27 }
 0x78e   :  { %2056 = vrcp.f32 %v606_v28 }
 0x798   :  { %v2057_v29 = vpop.eup %2056 }
 0x7f1   :  { %v612_v30 = vpop.permute.xlu0 %611 }
 0x7f2   :  { %v614_v31 = vmul.f32 %v2057_v29, %v612_v30 }
 0x7f4   :  { %616 = vrot.lane.b32.xlu1 %v614_v31, %s2170_s24 }
 0x866   :  { %v617_v32 = vpop.permute.xlu1 %616 }
 0x867   :  { %v619_v33 = vadd.f32 %v617_v32, %v522_v19 }
 0x869   :  { %2058 = vtanh.f32 %v619_v33 }
 0x873   :  { %v2059_v35 = vpop.eup %2058 }
 0x874   :  { %v621_v36 = vsub.f32 %v445_v10, %v2059_v35 }
 0x876   :  { %623 = vrot.lane.b32.xlu0 %v621_v36, %s2172_s26 }
 0x8e8   :  { %v624_v37 = vpop.permute.xlu0 %623 }
 0x8e9   :  { %v626_v38 = vmul.f32 %v2057_v29, %v624_v37 }
 0x8eb   :  { %628 = vrot.lane.b32.xlu1 %v626_v38, %s2173_s27 }
 0x8ef   :  { %635 = vperm.xlu1 %2036, %v2249_v3  }
 0x8f3   :  { %2037 = vset.pattern.permute.xlu1 %v2176_v62 }
 0x95d   :  { %v629_v39 = vpop.permute.xlu1 %628 }
 0x95e   :  { %v631_v40 = vadd.f32 %v2059_v35, %v629_v39 }
 0x960   :  { %v2357_v41 = vsel %vm526_vm7, %v631_v40, 0.0  ;;  %v632_v43 = vsel %vm526_vm7, %v631_v40, %v445_v10 }
 0x961   :  { %715 = vrot.lane.b32.xlu0 %v632_v43, %s2170_s24 }
 0x96e   :  { %v636_v44 = vpop.permute.xlu1 %635 }
 0x96f   :  { %vm637_vm8 = vcmp.eq.s32.totalorder %v2279_v18, %v636_v44 }
 0x970   :  { %v1641_v45 = vsel %vm637_vm8, 1.0, %v2169_v2 }
 0x971   :  { %1816 = vmatmul.mubr.msk.f32.vlgmr.msra.gmra.mrb[6].mxu0 %vm78_vm1, %v1641_v45 }
 0x972   :  { %1967 = vmatpush3.bf16.msra.mxu0 %v2257_v14  ;;  %1837 = vmatprep.mubr.msk.f32.mxu0 %vm2168_vm0, %v2169_v2 }
 0x973   :  { %1968 = vmatprep.subr.bf16.mxu0 %v2167_v1 }
 0x976   :  { %1970 = vmatpush3.bf16.msra.mxu0 %v2264_v16 }
 0x977   :  { %1977 = vmatprep.subr.bf16.mxu0 %v2167_v1 }
 0x9d3   :  { %v716_v46 = vpop.permute.xlu0 %715 }
 0x9d4   :  { %1827 = vmatmul.mubr.msk.f32.vlgmr.msra.gmra.mrb[6].mxu1 %vm78_vm1, %v716_v46 }
 0x9d5   :  { %1973 = vmatpush3.bf16.msra.mxu1 %v2252_v6  ;;  %1848 = vmatprep.mubr.msk.f32.mxu1 %vm2168_vm0, %v2169_v2 }
 0x9d6   :  { %1974 = vmatprep.subr.bf16.mxu1 %v2167_v1 }
 0x9d9   :  { %1976 = vmatpush3.bf16.msra.mxu1 %v2255_v13 }
 0x9da   :  { %1983 = vmatprep.subr.bf16.mxu1 %v2167_v1 }
 0xa44   :  { %v709_v47 = vpop.f32.mrb[6].mxu0 }
 0xa45   :  { %v1817_v49 = vpop.f32.mrb[7].mxu0 }
 0xaa7   :  { %v785_v50 = vpop.f32.mrb[6].mxu1 }
 0xaa8   :  { %v789_v51 = vadd.f32 %v785_v50, %v709_v47  ;;  %v796_v52 = vadd.f32 %v785_v50, %v2290_v21  ;;  %v1828_v53 = vpop.f32.mrb[7].mxu1 }
 0xaaa   :  { %798 = vrot.lane.b32.xlu0 %v796_v52, %s2170_s24  ;;  %v1644_v54 = vmul.f32 -1.442695, %v789_v51 }
 0xaac   :  { %2060 = vpow2.f32 %v1644_v54 }
 0xab6   :  { %v2061_v55 = vpop.eup %2060 }
 0xab7   :  { %v793_v56 = vadd.f32 1.0, %v2061_v55 }
 0xab9   :  { %2062 = vrcp.f32 %v793_v56 }
 0xac3   :  { %v2063_v57 = vpop.eup %2062 }
 0xb1c   :  { %v799_v58 = vpop.permute.xlu0 %798 }
 0xb1d   :  { %v801_v59 = vmul.f32 %v2063_v57, %v799_v58 }
 0xb1f   :  { %803 = vrot.lane.b32.xlu1 %v801_v59, %s2170_s24 }
 0xb91   :  { %v804_v60 = vpop.permute.xlu1 %803 }
 0xb92   :  { %v806_v61 = vadd.f32 %v804_v60, %v709_v47 }
 0xb94   :  { %2064 = vtanh.f32 %v806_v61 }
 0xb9e   :  { %v2065_v63 = vpop.eup %2064 }
 0xb9f   :  { %v808_v0 = vsub.f32 %v632_v43, %v2065_v63 }
 0xba1   :  { %810 = vrot.lane.b32.xlu0 %v808_v0, %s2172_s26 }
 0xc13   :  { %v811_v4 = vpop.permute.xlu0 %810 }
 0xc14   :  { %v813_v5 = vmul.f32 %v2063_v57, %v811_v4 }
 0xc16   :  { %815 = vrot.lane.b32.xlu1 %v813_v5, %s2173_s27 }
 0xc1a   :  { %822 = vperm.xlu1 %2037, %v2249_v3  }
 0xc1e   :  { %2038 = vset.pattern.permute.xlu1 %v2177_v34 }
 0xc88   :  { %v816_v7 = vpop.permute.xlu1 %815 }
 0xc89   :  { %v818_v8 = vadd.f32 %v2065_v63, %v816_v7  ;;  %v2178_v63 = vmov 6  }
 0xc8b   :  { %v819_v9 = vsel %vm713_vm9, %v818_v8, %v632_v43  ;;  %v2383_v10 = vsel %vm713_vm9, %v818_v8, 0.0 }
 0xc8c   :  { %902 = vrot.lane.b32.xlu0 %v819_v9, %s2170_s24 }
 0xc99   :  { %v823_v12 = vpop.permute.xlu1 %822 }
 0xc9a   :  { %vm824_vm10 = vcmp.eq.s32.totalorder %v2279_v18, %v823_v12 }
 0xc9b   :  { %v1645_v15 = vsel %vm824_vm10, 1.0, %v2169_v2 }
 0xc9c   :  { %1838 = vmatmul.mubr.msk.f32.vlgmr.msra.gmra.mrb[8].mxu0 %vm78_vm1, %v1645_v15 }
 0xc9d   :  { %1979 = vmatpush3.bf16.msra.mxu0 %v2257_v14  ;;  %1859 = vmatprep.mubr.msk.f32.mxu0 %vm2168_vm0, %v2169_v2 }
 0xc9e   :  { %1980 = vmatprep.subr.bf16.mxu0 %v2167_v1 }
 0xca1   :  { %1982 = vmatpush3.bf16.msra.mxu0 %v2264_v16 }
 0xca2   :  { %1989 = vmatprep.subr.bf16.mxu0 %v2167_v1 }
 0xcfe   :  { %v903_v17 = vpop.permute.xlu0 %902 }
 0xcff   :  { %1849 = vmatmul.mubr.msk.f32.vlgmr.msra.gmra.mrb[8].mxu1 %vm78_vm1, %v903_v17 }
 0xd00   :  { %1985 = vmatpush3.bf16.msra.mxu1 %v2252_v6  ;;  %1870 = vmatprep.mubr.msk.f32.mxu1 %vm2168_vm0, %v2169_v2 }
 0xd01   :  { %1986 = vmatprep.subr.bf16.mxu1 %v2167_v1 }
 0xd04   :  { %1988 = vmatpush3.bf16.msra.mxu1 %v2255_v13 }
 0xd05   :  { %1995 = vmatprep.subr.bf16.mxu1 %v2167_v1 }
 0xd6f   :  { %v896_v19 = vpop.f32.mrb[8].mxu0 }
 0xd70   :  { %v1839_v20 = vpop.f32.mrb[9].mxu0 }
 0xdd2   :  { %v972_v22 = vpop.f32.mrb[8].mxu1 }
 0xdd3   :  { %v976_v23 = vadd.f32 %v972_v22, %v896_v19  ;;  %v983_v24 = vadd.f32 %v972_v22, %v2290_v21  ;;  %v1850_v25 = vpop.f32.mrb[9].mxu1 }
 0xdd5   :  { %985 = vrot.lane.b32.xlu0 %v983_v24, %s2170_s24  ;;  %v1648_v26 = vmul.f32 -1.442695, %v976_v23 }
 0xdd7   :  { %2066 = vpow2.f32 %v1648_v26 }
 0xde1   :  { %v2067_v27 = vpop.eup %2066 }
 0xde2   :  { %v980_v28 = vadd.f32 1.0, %v2067_v27 }
 0xde4   :  { %2068 = vrcp.f32 %v980_v28 }
 0xdee   :  { %v2069_v29 = vpop.eup %2068 }
 0xe47   :  { %v986_v30 = vpop.permute.xlu0 %985 }
 0xe48   :  { %v988_v31 = vmul.f32 %v2069_v29, %v986_v30 }
 0xe4a   :  { %990 = vrot.lane.b32.xlu1 %v988_v31, %s2170_s24  ;;  %v2179_v31 = vmov 7  }
 0xe4b   :  { %2041 = vset.pattern.permute.xlu0 %v2179_v31 }
 0xebc   :  { %v991_v32 = vpop.permute.xlu1 %990 }
 0xebd   :  { %v993_v33 = vadd.f32 %v991_v32, %v896_v19 }
 0xebf   :  { %2070 = vtanh.f32 %v993_v33 }
 0xec9   :  { %v2071_v35 = vpop.eup %2070 }
 0xeca   :  { %v995_v36 = vsub.f32 %v819_v9, %v2071_v35 }
 0xecc   :  { %997 = vrot.lane.b32.xlu0 %v995_v36, %s2172_s26 }
 0xf3e   :  { %v998_v37 = vpop.permute.xlu0 %997 }
 0xf3f   :  { %v1000_v38 = vmul.f32 %v2069_v29, %v998_v37 }
 0xf41   :  { %1002 = vrot.lane.b32.xlu1 %v1000_v38, %s2173_s27 }
 0xf45   :  { %1009 = vperm.xlu1 %2038, %v2249_v3  }
 0xf49   :  { %2039 = vset.pattern.permute.xlu1 %v2178_v63 }
 0xfb3   :  { %v1003_v39 = vpop.permute.xlu1 %1002 }
 0xfb4   :  { %v1005_v40 = vadd.f32 %v2071_v35, %v1003_v39 }
 0xfb6   :  { %v1006_v43 = vsel %vm900_vm11, %v1005_v40, %v819_v9  ;;  %v2409_v44 = vsel %vm900_vm11, %v1005_v40, 0.0 }
 0xfb7   :  { %1089 = vrot.lane.b32.xlu0 %v1006_v43, %s2170_s24 }
 0xfc4   :  { %v1010_v45 = vpop.permute.xlu1 %1009 }
 0xfc5   :  { %vm1011_vm12 = vcmp.eq.s32.totalorder %v2279_v18, %v1010_v45 }
 0xfc6   :  { %v1649_v46 = vsel %vm1011_vm12, 1.0, %v2169_v2 }
 0xfc7   :  { %1860 = vmatmul.mubr.msk.f32.vlgmr.msra.gmra.mrb[10].mxu0 %vm78_vm1, %v1649_v46 }
 0xfc8   :  { %1991 = vmatpush3.bf16.msra.mxu0 %v2257_v14  ;;  %1881 = vmatprep.mubr.msk.f32.mxu0 %vm2168_vm0, %v2169_v2 }
 0xfc9   :  { %1992 = vmatprep.subr.bf16.mxu0 %v2167_v1 }
 0xfcc   :  { %1994 = vmatpush3.bf16.msra.mxu0 %v2264_v16 }
 0xfcd   :  { %2001 = vmatprep.subr.bf16.mxu0 %v2167_v1 }
0x1029   :  { %v1090_v47 = vpop.permute.xlu0 %1089 }
0x102a   :  { %1871 = vmatmul.mubr.msk.f32.vlgmr.msra.gmra.mrb[10].mxu1 %vm78_vm1, %v1090_v47 }
0x102b   :  { %1997 = vmatpush3.bf16.msra.mxu1 %v2252_v6  ;;  %1892 = vmatprep.mubr.msk.f32.mxu1 %vm2168_vm0, %v2169_v2 }
0x102c   :  { %1998 = vmatprep.subr.bf16.mxu1 %v2167_v1 }
0x102f   :  { %2000 = vmatpush3.bf16.msra.mxu1 %v2255_v13 }
0x1030   :  { %2007 = vmatprep.subr.bf16.mxu1 %v2167_v1 }
0x109a   :  { %v1083_v49 = vpop.f32.mrb[10].mxu0 }
0x109b   :  { %v1861_v50 = vpop.f32.mrb[11].mxu0 }
0x10fd   :  { %v1159_v51 = vpop.f32.mrb[10].mxu1 }
0x10fe   :  { %v1163_v52 = vadd.f32 %v1159_v51, %v1083_v49  ;;  %v1170_v53 = vadd.f32 %v1159_v51, %v2290_v21  ;;  %v1872_v54 = vpop.f32.mrb[11].mxu1 }
0x1100   :  { %1172 = vrot.lane.b32.xlu0 %v1170_v53, %s2170_s24  ;;  %v1652_v55 = vmul.f32 -1.442695, %v1163_v52 }
0x1102   :  { %2072 = vpow2.f32 %v1652_v55 }
0x110c   :  { %v2073_v56 = vpop.eup %2072 }
0x110d   :  { %v1167_v57 = vadd.f32 1.0, %v2073_v56 }
0x110f   :  { %2074 = vrcp.f32 %v1167_v57 }
0x1119   :  { %v2075_v58 = vpop.eup %2074 }
0x1172   :  { %v1173_v59 = vpop.permute.xlu0 %1172 }
0x1173   :  { %v1175_v60 = vmul.f32 %v2075_v58, %v1173_v59 }
0x1175   :  { %1177 = vrot.lane.b32.xlu1 %v1175_v60, %s2170_s24 }
0x11e7   :  { %v1178_v61 = vpop.permute.xlu1 %1177 }
0x11e8   :  { %v1180_v62 = vadd.f32 %v1178_v61, %v1083_v49 }
0x11ea   :  { %2076 = vtanh.f32 %v1180_v62 }
0x11f4   :  { %v2077_v0 = vpop.eup %2076 }
0x11f5   :  { %v1182_v4 = vsub.f32 %v1006_v43, %v2077_v0 }
0x11f7   :  { %1184 = vrot.lane.b32.xlu0 %v1182_v4, %s2172_s26 }
0x1269   :  { %v1185_v5 = vpop.permute.xlu0 %1184 }
0x126a   :  { %v1187_v7 = vmul.f32 %v2075_v58, %v1185_v5 }
0x126c   :  { %1189 = vrot.lane.b32.xlu1 %v1187_v7, %s2173_s27 }
0x1270   :  { %1196 = vperm.xlu1 %2039, %v2249_v3  }
0x1274   :  { %2040 = vset.pattern.permute.xlu1 %v2179_v31 }
0x12de   :  { %v1190_v8 = vpop.permute.xlu1 %1189 }
0x12df   :  { %v1192_v9 = vadd.f32 %v2077_v0, %v1190_v8 }
0x12e1   :  { %v1193_v12 = vsel %vm1087_vm13, %v1192_v9, %v1006_v43  ;;  %v2435_v15 = vsel %vm1087_vm13, %v1192_v9, 0.0 }
0x12e2   :  { %1276 = vrot.lane.b32.xlu0 %v1193_v12, %s2170_s24 }
0x12ef   :  { %v1197_v17 = vpop.permute.xlu1 %1196 }
0x12f0   :  { %vm1198_vm14 = vcmp.eq.s32.totalorder %v2279_v18, %v1197_v17 }
0x12f1   :  { %v1653_v19 = vsel %vm1198_vm14, 1.0, %v2169_v2 }
0x12f2   :  { %1882 = vmatmul.mubr.msk.f32.vlgmr.msra.gmra.mrb[12].mxu0 %vm78_vm1, %v1653_v19 }
0x12f3   :  { %2003 = vmatpush3.bf16.msra.mxu0 %v2257_v14  ;;  %1903 = vmatprep.mubr.msk.f32.mxu0 %vm2168_vm0, %v2169_v2 }
0x12f4   :  { %2004 = vmatprep.subr.bf16.mxu0 %v2167_v1 }
0x12f7   :  { %2006 = vmatpush3.bf16.msra.mxu0 %v2264_v16 }
0x1354   :  { %v1277_v20 = vpop.permute.xlu0 %1276 }
0x1355   :  { %1893 = vmatmul.mubr.msk.f32.vlgmr.msra.gmra.mrb[12].mxu1 %vm78_vm1, %v1277_v20 }
0x1356   :  { %2009 = vmatpush3.bf16.msra.mxu1 %v2252_v6  ;;  %1914 = vmatprep.mubr.msk.f32.mxu1 %vm2168_vm0, %v2169_v2 }
0x1357   :  { %2010 = vmatprep.subr.bf16.mxu1 %v2167_v1 }
0x135a   :  { %2012 = vmatpush3.bf16.msra.mxu1 %v2255_v13 }
0x13c5   :  { %v1270_v14 = vpop.f32.mrb[12].mxu0 }
0x13c6   :  { %v1883_v22 = vpop.f32.mrb[13].mxu0 }
0x1428   :  { %v1346_v23 = vpop.f32.mrb[12].mxu1 }
0x1429   :  { %v1350_v24 = vadd.f32 %v1346_v23, %v1270_v14  ;;  %v1357_v25 = vadd.f32 %v1346_v23, %v2290_v21  ;;  %v1894_v26 = vpop.f32.mrb[13].mxu1 }
0x142b   :  { %1359 = vrot.lane.b32.xlu0 %v1357_v25, %s2170_s24  ;;  %v1656_v16 = vmul.f32 -1.442695, %v1350_v24 }
0x142d   :  { %2078 = vpow2.f32 %v1656_v16 }
0x1437   :  { %v2079_v27 = vpop.eup %2078 }
0x1438   :  { %v1354_v6 = vadd.f32 1.0, %v2079_v27 }
0x143a   :  { %2080 = vrcp.f32 %v1354_v6 }
0x1444   :  { %v2081_v28 = vpop.eup %2080 }
0x149d   :  { %v1360_v29 = vpop.permute.xlu0 %1359 }
0x149e   :  { %v1362_v30 = vmul.f32 %v2081_v28, %v1360_v29 }
0x14a0   :  { %1364 = vrot.lane.b32.xlu1 %v1362_v30, %s2170_s24 }
0x1512   :  { %v1365_v1 = vpop.permute.xlu1 %1364 }
0x1513   :  { %v1367_v13 = vadd.f32 %v1365_v1, %v1270_v14 }
0x1515   :  { %2082 = vtanh.f32 %v1367_v13 }
0x151f   :  { %v2083_v32 = vpop.eup %2082 }
0x1520   :  { %v1369_v33 = vsub.f32 %v1193_v12, %v2083_v32 }
0x1522   :  { %1371 = vrot.lane.b32.xlu0 %v1369_v33, %s2172_s26 }
0x1594   :  { %v1372_v34 = vpop.permute.xlu0 %1371 }
0x1595   :  { %v1374_v35 = vmul.f32 %v2081_v28, %v1372_v34 }
0x1597   :  { %1376 = vrot.lane.b32.xlu1 %v1374_v35, %s2173_s27 }
0x159b   :  { %1383 = vperm.xlu1 %2040, %v2249_v3  }
0x1609   :  { %v1377_v36 = vpop.permute.xlu1 %1376 }
0x160a   :  { %v1379_v37 = vadd.f32 %v2083_v32, %v1377_v36 }
0x160c   :  { %v1381_v38 = vsel %vm1274_vm15, %v1379_v37, 0.0  ;;  %v1380_v39 = vsel %vm1274_vm15, %v1379_v37, %v1193_v12 }
0x160d   :  { %1463 = vrot.lane.b32.xlu0 %v1380_v39, %s2170_s24 }
0x161a   :  { %v1384_v40 = vpop.permute.xlu1 %1383 }
0x161b   :  { %vm1385_vm0 = vcmp.eq.s32.totalorder %v2279_v18, %v1384_v40 }
0x161c   :  { %v1657_v43 = vsel %vm1385_vm0, 1.0, %v2169_v2 }
0x161d   :  { %1904 = vmatmul.mubr.msk.f32.vlgmr.msra.gmra.mrb[14].mxu0 %vm78_vm1, %v1657_v43 }
0x167f   :  { %v1464_v45 = vpop.permute.xlu0 %1463 }
0x1680   :  { %1915 = vmatmul.mubr.msk.f32.vlgmr.msra.gmra.mrb[14].mxu1 %vm78_vm1, %v1464_v45 }
0x16f0   :  { %v1457_v46 = vpop.f32.mrb[14].mxu0 }
0x16f1   :  { %v1905_v3 = vpop.f32.mrb[15].mxu0 }
0x1753   :  { %v1533_v47 = vpop.f32.mrb[14].mxu1 }
0x1754   :  { %v1537_v49 = vadd.f32 %v1533_v47, %v1457_v46  ;;  %v1544_v50 = vadd.f32 %v1533_v47, %v2290_v21  ;;  %v1916_v51 = vpop.f32.mrb[15].mxu1 }
0x1756   :  { %1546 = vrot.lane.b32.xlu0 %v1544_v50, %s2170_s24  ;;  %v1660_v52 = vmul.f32 -1.442695, %v1537_v49 }
0x1758   :  { %2084 = vpow2.f32 %v1660_v52 }
0x1762   :  { %v2085_v53 = vpop.eup %2084 }
0x1763   :  { %v1541_v18 = vadd.f32 1.0, %v2085_v53 }
0x1765   :  { %2086 = vrcp.f32 %v1541_v18 }
0x176f   :  { %v2087_v2 = vpop.eup %2086 }
0x17c8   :  { %v1547_v54 = vpop.permute.xlu0 %1546 }
0x17c9   :  { %v1549_v55 = vmul.f32 %v2087_v2, %v1547_v54 }
0x17cb   :  { %1551 = vrot.lane.b32.xlu1 %v1549_v55, %s2170_s24 }
0x183d   :  { %v1552_v56 = vpop.permute.xlu1 %1551 }
0x183e   :  { %v1554_v57 = vadd.f32 %v1552_v56, %v1457_v46 }
0x1840   :  { %2088 = vtanh.f32 %v1554_v57 }
0x184a   :  { %v2089_v58 = vpop.eup %2088 }
0x184b   :  { %v1556_v59 = vsub.f32 %v1380_v39, %v2089_v58 }
0x184d   :  { %1558 = vrot.lane.b32.xlu0 %v1556_v59, %s2172_s26 }
0x1851   :  { %1571 = vrot.lane.b32.xlu0 %v2331_v11, %s2172_s26 }
0x1855   :  { %1583 = vrot.lane.b32.xlu0 %v2435_v15, %s2172_s26 }
0x18bf   :  { %v1559_v21 = vpop.permute.xlu0 %1558 }
0x18c0   :  { %v1561_v60 = vmul.f32 %v2087_v2, %v1559_v21 }
0x18c2   :  { %1563 = vrot.lane.b32.xlu1 %v1561_v60, %s2173_s27 }
0x18c3   :  { %v1572_v11 = vpop.permute.xlu0 %1571 }
0x18c6   :  { %1579 = vrot.lane.b32.xlu1 %v2409_v44, %s2170_s24  ;;  %v1590_v44 = vsel %vm78_vm1, %v2314_v48, %v1572_v11 }
0x18c7   :  { %v1584_v5 = vpop.permute.xlu0 %1583  ;;  %v1592_v42 = vsel %vm1591_vm3, %v1590_v44, %v2357_v41 }
0x18ca   :  { %1575 = vrot.lane.b32.xlu1 %v2383_v10, %s2173_s27 }
0x1934   :  { %v1564_v61 = vpop.permute.xlu1 %1563 }
0x1935   :  { %v1566_v62 = vadd.f32 %v2089_v58, %v1564_v61 }
0x1937   :  { %v1568_v63 = vsel %vm1461_vm2, %v1566_v62, 0.0  ;;  %v1567_v0 = vsel %vm1461_vm2, %v1566_v62, %v1380_v39 }
0x1938   :  { %1587 = vrot.lane.b32.xlu0 %v1568_v63, %s2173_s27  ;;  %1604 = vrot.lane.b32.xlu1 %v1567_v0, %s2170_s24  ;;  %v1580_v4 = vpop.permute.xlu1 %1579 }
0x1939   :  { %v1595_v10 = vsel %vm78_vm1, %v1580_v4, %v1584_v5 }
0x193a   :  { %v1596_v9 = vsel %vm1591_vm3, %v1595_v10, %v1381_v38 }
0x193c   :  { %v1576_v7 = vpop.permute.xlu1 %1575 }
0x193d   :  { %v1594_v15 = vsel %vm1593_vm4, %v1592_v42, %v1576_v7 }
0x19aa   :  { %v1605_v8 = vpop.permute.xlu1 %1604  ;;  %v1588_v12 = vpop.permute.xlu0 %1587 }
0x19ab   :  { %v1597_v17 = vsel %vm1593_vm4, %v1596_v9, %v1588_v12  ;;  %1608 = vst.msk [vmem:[#allocation7] sm:$0xf] %vm1607_vm5, %v1605_v8 }
0x19ac   :  { %v1600_v19 = vcombine.low %v1594_v15, %v1597_v17 }
0x19ad   :  { %2145 = shalt.err (!%p2142_p6)
}
0x19ae   :  { %s2146_s8 = scalar_lea.hbm %s2505_s6, 64 }
0x19af   :  { %p2147_p7 = scmp.ne.s32.totalorder %s2505_s6, %s2146_s8  ;;  %p2150_p8 = scmp.lt.u32.totalorder %s2146_s8, %s2505_s6 }
0x19b1   :  { %p2152_p9 = pnand %p2150_p8, %p2147_p7 }
0x19b3   :  { %2155 = shalt.err (!%p2152_p9)
}
0x19b4   :  { %1620 = dma.vmem_to_hbm [thread:$0]  %s1618_s28, 64, %s2505_s6, [#allocation4]   ;;  %1602 = vst [vmem:[%s2504_s5] sm:$0xff] %v1600_v19 }
0x19b5   :  { %2160 = dma.done.wait [#allocation4], 64  }
0x19b6   :  { %2161 = vsyncadd [#allocation4], 4294967232 }
0x19b7   :  { %1626 = vsyncpa [#allocation3], 1 }
0x19b8   :  { %1627 = vsyncpa [#allocation6], 1 }
0x19b9   :  { %1628 = vsyncpa [#allocation4], 1 }

</bundles_post_ra>
